<compile_context>
chip_gen: v7x
topology: tpu7x:2x2x1
jax: 0.10.0
libtpu: 0.0.40
codegen_flags: <defaults>
</compile_context>

<pallas_src>
import jax
import jax.numpy as jnp
from jax import lax
from jax.experimental import pallas as pl
from jax.experimental.pallas import tpu as pltpu

BN_EPS = 1e-5
LEAKY_SLOPE = 0.1


def _leaky(y):
    return jnp.where(y > 0, y, LEAKY_SLOPE * y)


def _edge_masks(H, W, b_tile):
    """(4, b_tile*H*W) f32 validity masks for the flattened lane layout.

    Row 0: keep where col != W-1  (source mask for taps reading the LEFT  neighbour)
    Row 1: keep where col != 0    (source mask for taps reading the RIGHT neighbour)
    Row 2: keep where row != 0    (output mask for taps reading the row ABOVE)
    Row 3: keep where row != H-1  (output mask for taps reading the row BELOW)
    Rows/cols are per-image, so rolled taps cannot bleed across images batched on
    the lane axis (the roll wrap-around is always masked to zero).
    """
    l = jnp.arange(b_tile * H * W)
    x = l % W
    y = (l // W) % H
    m = jnp.stack([x != W - 1, x != 0, y != 0, y != H - 1], axis=0)
    return m.astype(jnp.float32)


def _make_conv5_kernel(W, L):
    """Fused 5-stage Conv5 kernel; activations are (channels, L), L = lane axis."""

    def kernel(x_ref, mask_ref, w1_ref, b1_ref, w3_ref, b3_ref, o_ref):
        # x_ref   : (C, L)       bf16  activations, (image, y, x) flattened on lanes
        # mask_ref: (4, L)       f32   edge masks (see _edge_masks)
        # w1_ref  : (Cmid, C)    bf16  1x1 weights, BN scale folded in
        # b1_ref  : (Cmid, 1)    f32   folded BN bias
        # w3_ref  : (C, 9*Cmid)  bf16  3x3 weights as im2col matrix (tap-major)
        # b3_ref  : (C, 1)       f32
        # o_ref   : (Cmid, L)    bf16
        masks = mask_ref[...]
        ck_left, ck_right, rk_top, rk_bot = (
            masks[0:1], masks[1:2], masks[2:3], masks[3:4])
        w1 = w1_ref[...]
        b1 = b1_ref[...]
        w3 = w3_ref[...]
        b3 = b3_ref[...]

        def conv1x1(a):                       # (C, L) bf16 -> (Cmid, L) bf16
            y = lax.dot_general(w1, a, (((1,), (0,)), ((), ())),
                                preferred_element_type=jnp.float32)
            return _leaky(y + b1).astype(jnp.bfloat16)

        def conv3x3(a):                       # (Cmid, L) bf16 -> (C, L) bf16
            af = a.astype(jnp.float32)        # tap/mask math in f32 (v5e-safe)
            # Shared column variants: source col W-1 / col 0 zeroed once, reused
            # by all taps that read the left / right neighbour.
            srcs = (af * ck_left, af, af * ck_right)

            def tap(dy, dx):                  # zero-padded 'same' tap, (Cmid, L) f32
                s = (-(dy * W + dx)) % L      # pltpu.roll == jnp.roll semantics
                t = srcs[dx + 1]
                return pltpu.roll(t, s, axis=1) if s else t

            def group(dy, rmask):             # one ky-row of the im2col stack
                g = jnp.concatenate([tap(dy, -1), tap(dy, 0), tap(dy, 1)], axis=0)
                return g if rmask is None else g * rmask

            # Single K = 9*Cmid MXU matmul on a bf16 im2col stack (tap-major order
            # matching the weight layout).
            stack = jnp.concatenate(
                [group(-1, rk_top), group(0, None), group(1, rk_bot)],
                axis=0).astype(jnp.bfloat16)  # (9*Cmid, L)
            y = lax.dot_general(w3, stack, (((1,), (0,)), ((), ())),
                                preferred_element_type=jnp.float32)
            return _leaky(y + b3).astype(jnp.bfloat16)

        a = x_ref[...]                        # bf16, no up-cast needed
        a = conv1x1(a)                        # shared weights reused, as in Conv5
        a = conv3x3(a)
        a = conv1x1(a)
        a = conv3x3(a)
        a = conv1x1(a)
        o_ref[...] = a.astype(o_ref.dtype)

    return kernel


@jax.jit
def conv5_forward(x_nchw, params):
    """x_nchw: (N, C, H, W) f32; params from prepare_kernel_params.  Returns f32."""
    N, C, H, W = x_nchw.shape
    cmid = params["w1"].shape[0]
    P = H * W

    # Batch b_tile images onto the lane axis of each grid step (biggest lever at
    # small channel counts: larger MXU N-dim, amortized per-step overhead).  For
    # v7x production sizes one would instead keep >=2 steps per TensorCore via a
    # spatial row-tile grid axis with a 2-row halo.
    b_tile = max(1, min(N, max(1, 1024 // P)))
    while N % b_tile:
        b_tile -= 1
    L_blk = b_tile * P
    n_blk = N // b_tile

    # Layout plumbing in the wrapper: NCHW -> (C, N*H*W); lane axis = (image, y, x).
    # Activations cross HBM in bf16 (the kernel computes its matmuls in bf16 anyway).
    x_cl = jnp.transpose(x_nchw, (1, 0, 2, 3)).reshape(C, N * P).astype(jnp.bfloat16)
    masks = _edge_masks(H, W, b_tile)

    out_cl = pl.pallas_call(
        _make_conv5_kernel(W, L_blk),
        out_shape=jax.ShapeDtypeStruct((cmid, N * P), jnp.bfloat16),
        grid_spec=pltpu.PrefetchScalarGridSpec(
            num_scalar_prefetch=0,
            grid=(n_blk,),
            in_specs=[
                pl.BlockSpec((C, L_blk), lambda i: (0, i)),
                # Constant index maps: masks/weights DMA'd once, VMEM-resident.
                # (Production: add pipeline_mode=pl.Buffered(1) to these.)
                pl.BlockSpec((4, L_blk), lambda i: (0, 0)),
                pl.BlockSpec((cmid, C), lambda i: (0, 0)),
                pl.BlockSpec((cmid, 1), lambda i: (0, 0)),
                pl.BlockSpec((C, 9 * cmid), lambda i: (0, 0)),
                pl.BlockSpec((C, 1), lambda i: (0, 0)),
            ],
            out_specs=pl.BlockSpec((cmid, L_blk), lambda i: (0, i)),
        ),
        compiler_params=pltpu.CompilerParams(
            dimension_semantics=("parallel",),
            vmem_limit_bytes=32 * 1024 * 1024,   # explicit, safe on v5e/v6e/v7x
        ),
    )(x_cl, masks, params["w1"], params["b1"], params["w3"], params["b3"])

    out = out_cl.reshape(cmid, N, H, W).transpose(1, 0, 2, 3)
    return out.astype(jnp.float32)


# ----------------------------------------------------------------------------
# Parameter construction (deterministic, synthetic), BN folding, and a pure-JAX
# reference used only for a correctness check in __main__.
# ----------------------------------------------------------------------------
def init_raw_params(key, in_channels):
    cmid = in_channels // 2
    ks = jax.random.split(key, 10)
    p = {}
    # conv1x1: torch weight (cmid, in_channels, 1, 1) stored as (cmid, in_channels)
    p["w1"] = 0.1 * jax.random.normal(ks[0], (cmid, in_channels), jnp.float32)
    p["g1"] = 1.0 + 0.1 * jax.random.normal(ks[1], (cmid,), jnp.float32)
    p["beta1"] = 0.1 * jax.random.normal(ks[2], (cmid,), jnp.float32)
    p["rm1"] = 0.1 * jax.random.normal(ks[3], (cmid,), jnp.float32)
    p["rv1"] = jax.random.uniform(ks[4], (cmid,), jnp.float32, 0.5, 1.5)
    # conv3x3: torch weight (in_channels, cmid, 3, 3)
    p["w3"] = 0.1 * jax.random.normal(ks[5], (in_channels, cmid, 3, 3), jnp.float32)
    p["g3"] = 1.0 + 0.1 * jax.random.normal(ks[6], (in_channels,), jnp.float32)
    p["beta3"] = 0.1 * jax.random.normal(ks[7], (in_channels,), jnp.float32)
    p["rm3"] = 0.1 * jax.random.normal(ks[8], (in_channels,), jnp.float32)
    p["rv3"] = jax.random.uniform(ks[9], (in_channels,), jnp.float32, 0.5, 1.5)
    return p


def fold_bn(gamma, beta, mean, var, eps=BN_EPS):
    scale = gamma / jnp.sqrt(var + eps)
    bias = beta - mean * scale
    return scale, bias


def prepare_kernel_params(raw):
    """Fold BN into weights/bias, reshape for the kernel, cast weights to bf16."""
    s1, b1 = fold_bn(raw["g1"], raw["beta1"], raw["rm1"], raw["rv1"])
    s3, b3 = fold_bn(raw["g3"], raw["beta3"], raw["rm3"], raw["rv3"])
    cmid, cin = raw["w1"].shape
    w1 = (s1[:, None] * raw["w1"]).astype(jnp.bfloat16)                 # (cmid, cin)
    # (cout, cin3, 3, 3) -> (cout, 3, 3, cin3) -> (cout, 9*cin3), tap-major K
    w3_mat = raw["w3"].transpose(0, 2, 3, 1).reshape(cin, 9 * cmid)
    w3 = (s3[:, None] * w3_mat).astype(jnp.bfloat16)                    # (cin, 9*cmid)
    return {
        "w1": w1, "b1": b1.reshape(cmid, 1).astype(jnp.float32),
        "w3": w3, "b3": b3.reshape(cin, 1).astype(jnp.float32),
    }


def conv5_reference(x, raw):
    """Pure-JAX (XLA) reference matching the PyTorch module, all in f32."""
    def bn_leaky(y, gamma, beta, mean, var):
        s = gamma / jnp.sqrt(var + BN_EPS)
        b = beta - mean * s
        y = y * s[None, :, None, None] + b[None, :, None, None]
        return jnp.where(y > 0, y, LEAKY_SLOPE * y)

    def c1(x):
        w = raw["w1"][:, :, None, None]
        y = lax.conv_general_dilated(x, w, (1, 1), "SAME",
                                     dimension_numbers=("NCHW", "OIHW", "NCHW"))
        return bn_leaky(y, raw["g1"], raw["beta1"], raw["rm1"], raw["rv1"])

    def c3(x):
        y = lax.conv_general_dilated(x, raw["w3"], (1, 1), "SAME",
                                     dimension_numbers=("NCHW", "OIHW", "NCHW"))
        return bn_leaky(y, raw["g3"], raw["beta3"], raw["rm3"], raw["rv3"])

    return c1(c3(c1(c3(c1(x)))))


if __name__ == "__main__":
    key = jax.random.PRNGKey(0)
    k_x, k_p = jax.random.split(key)

    N, C, H, W = 2, 16, 16, 16              # in_channels=16 -> mid=8; H*W=256 lanes
    x = jax.random.normal(k_x, (N, C, H, W), jnp.float32)

    raw = init_raw_params(k_p, C)
    kparams = prepare_kernel_params(raw)

    out = conv5_forward(x, kparams)
    jax.block_until_ready(out)
    assert out.shape == (N, C // 2, H, W), out.shape   # final 1x1 halves channels

    ref = conv5_reference(x, raw)
    err = float(jnp.max(jnp.abs(out - ref)))
    assert err < 6e-2, f"max abs error vs reference = {err}"
    print("KERNEL_OK")
</pallas_src>

<mosaic_0001>
module attributes {stable_mosaic.version = 11 : i64} {
  func.func @kernel(%arg0: i32, %arg1: memref<16x512xbf16, #tpu.memory_space<vmem>>, %arg2: memref<4x512xf32, #tpu.memory_space<vmem>>, %arg3: memref<8x16xbf16, #tpu.memory_space<vmem>>, %arg4: memref<8x1xf32, #tpu.memory_space<vmem>>, %arg5: memref<16x72xbf16, #tpu.memory_space<vmem>>, %arg6: memref<16x1xf32, #tpu.memory_space<vmem>>, %arg7: memref<8x512xbf16, #tpu.memory_space<vmem>>) attributes {dimension_semantics = [#tpu.dimension_semantics<parallel>], iteration_bounds = array<i64: 1>, scalar_prefetch = 0 : i64, scratch_operands = 0 : i64, tpu.core_type = #tpu.core_type<tc>, window_params = [{transform_indices = @transform_0, window_bounds = array<i64: 16, 512>}, {pipeline_mode = #tpu.pipeline_mode<synchronous>, transform_indices = @transform_1, window_bounds = array<i64: 4, 512>}, {pipeline_mode = #tpu.pipeline_mode<synchronous>, transform_indices = @transform_2, window_bounds = array<i64: 8, 16>}, {pipeline_mode = #tpu.pipeline_mode<synchronous>, transform_indices = @transform_3, window_bounds = array<i64: 8, 1>}, {pipeline_mode = #tpu.pipeline_mode<synchronous>, transform_indices = @transform_4, window_bounds = array<i64: 16, 72>}, {pipeline_mode = #tpu.pipeline_mode<synchronous>, transform_indices = @transform_5, window_bounds = array<i64: 16, 1>}, {transform_indices = @transform_6, window_bounds = array<i64: 8, 512>}]} {
    %c0 = arith.constant 0 : index
    %c0_0 = arith.constant 0 : index
    %0 = vector.load %arg2[%c0, %c0_0] : memref<4x512xf32, #tpu.memory_space<vmem>>, vector<4x512xf32>
    %1 = vector.extract_strided_slice %0 {offsets = [0, 0], sizes = [1, 512], strides = [1, 1]} : vector<4x512xf32> to vector<1x512xf32>
    %2 = vector.extract_strided_slice %0 {offsets = [1, 0], sizes = [1, 512], strides = [1, 1]} : vector<4x512xf32> to vector<1x512xf32>
    %3 = vector.extract_strided_slice %0 {offsets = [2, 0], sizes = [1, 512], strides = [1, 1]} : vector<4x512xf32> to vector<1x512xf32>
    %4 = vector.extract_strided_slice %0 {offsets = [3, 0], sizes = [1, 512], strides = [1, 1]} : vector<4x512xf32> to vector<1x512xf32>
    %c0_1 = arith.constant 0 : index
    %c0_2 = arith.constant 0 : index
    %5 = vector.load %arg3[%c0_1, %c0_2] : memref<8x16xbf16, #tpu.memory_space<vmem>>, vector<8x16xbf16>
    %c0_3 = arith.constant 0 : index
    %c0_4 = arith.constant 0 : index
    %6 = vector.load %arg4[%c0_3, %c0_4] : memref<8x1xf32, #tpu.memory_space<vmem>>, vector<8x1xf32>
    %c0_5 = arith.constant 0 : index
    %c0_6 = arith.constant 0 : index
    %7 = vector.load %arg5[%c0_5, %c0_6] : memref<16x72xbf16, #tpu.memory_space<vmem>>, vector<16x72xbf16>
    %c0_7 = arith.constant 0 : index
    %c0_8 = arith.constant 0 : index
    %8 = vector.load %arg6[%c0_7, %c0_8] : memref<16x1xf32, #tpu.memory_space<vmem>>, vector<16x1xf32>
    %c0_9 = arith.constant 0 : index
    %c0_10 = arith.constant 0 : index
    %9 = vector.load %arg1[%c0_9, %c0_10] : memref<16x512xbf16, #tpu.memory_space<vmem>>, vector<16x512xbf16>
    %cst = arith.constant dense<0.000000e+00> : vector<8x512xf32>
    %10 = tpu.matmul %5, %9, %cst {dimension_numbers = #tpu.dot_dimension_numbers<[1], [0], [0], [1], [0, 0, 1, 1], [], []>} : vector<8x16xbf16>, vector<16x512xbf16>, vector<8x512xf32> -> vector<8x512xf32>
    %11 = vector.broadcast %6 : vector<8x1xf32> to vector<8x512xf32>
    %12 = arith.addf %10, %11 : vector<8x512xf32>
    %cst_11 = arith.constant 0.000000e+00 : f32
    %13 = vector.broadcast %cst_11 : f32 to vector<8x512xf32>
    %14 = arith.cmpf ogt, %12, %13 : vector<8x512xf32>
    %cst_12 = arith.constant 1.000000e-01 : f32
    %15 = vector.broadcast %cst_12 : f32 to vector<8x512xf32>
    %16 = arith.mulf %15, %12 : vector<8x512xf32>
    %17 = arith.select %14, %12, %16 : vector<8x512xi1>, vector<8x512xf32>
    %18 = arith.truncf %17 : vector<8x512xf32> to vector<8x512xbf16>
    %19 = arith.extf %18 : vector<8x512xbf16> to vector<8x512xf32>
    %20 = vector.broadcast %1 : vector<1x512xf32> to vector<8x512xf32>
    %21 = arith.mulf %19, %20 : vector<8x512xf32>
    %22 = vector.broadcast %2 : vector<1x512xf32> to vector<8x512xf32>
    %23 = arith.mulf %19, %22 : vector<8x512xf32>
    %c17_i32 = arith.constant 17 : i32
    %24 = tpu.dynamic_rotate %21 by %c17_i32 dim 1 : vector<8x512xf32>, i32 -> vector<8x512xf32>
    %c16_i32 = arith.constant 16 : i32
    %25 = tpu.dynamic_rotate %19 by %c16_i32 dim 1 : vector<8x512xf32>, i32 -> vector<8x512xf32>
    %c15_i32 = arith.constant 15 : i32
    %26 = tpu.dynamic_rotate %23 by %c15_i32 dim 1 : vector<8x512xf32>, i32 -> vector<8x512xf32>
    %27 = tpu.concatenate %24, %25, %26 in 0 : vector<8x512xf32>, vector<8x512xf32>, vector<8x512xf32> -> vector<24x512xf32>
    %28 = vector.broadcast %3 : vector<1x512xf32> to vector<24x512xf32>
    %29 = arith.mulf %27, %28 : vector<24x512xf32>
    %c1_i32 = arith.constant 1 : i32
    %30 = tpu.dynamic_rotate %21 by %c1_i32 dim 1 : vector<8x512xf32>, i32 -> vector<8x512xf32>
    %c511_i32 = arith.constant 511 : i32
    %31 = tpu.dynamic_rotate %23 by %c511_i32 dim 1 : vector<8x512xf32>, i32 -> vector<8x512xf32>
    %32 = tpu.concatenate %30, %19, %31 in 0 : vector<8x512xf32>, vector<8x512xf32>, vector<8x512xf32> -> vector<24x512xf32>
    %c497_i32 = arith.constant 497 : i32
    %33 = tpu.dynamic_rotate %21 by %c497_i32 dim 1 : vector<8x512xf32>, i32 -> vector<8x512xf32>
    %c496_i32 = arith.constant 496 : i32
    %34 = tpu.dynamic_rotate %19 by %c496_i32 dim 1 : vector<8x512xf32>, i32 -> vector<8x512xf32>
    %c495_i32 = arith.constant 495 : i32
    %35 = tpu.dynamic_rotate %23 by %c495_i32 dim 1 : vector<8x512xf32>, i32 -> vector<8x512xf32>
    %36 = tpu.concatenate %33, %34, %35 in 0 : vector<8x512xf32>, vector<8x512xf32>, vector<8x512xf32> -> vector<24x512xf32>
    %37 = vector.broadcast %4 : vector<1x512xf32> to vector<24x512xf32>
    %38 = arith.mulf %36, %37 : vector<24x512xf32>
    %39 = tpu.concatenate %29, %32, %38 in 0 : vector<24x512xf32>, vector<24x512xf32>, vector<24x512xf32> -> vector<72x512xf32>
    %40 = arith.truncf %39 : vector<72x512xf32> to vector<72x512xbf16>
    %cst_13 = arith.constant dense<0.000000e+00> : vector<16x512xf32>
    %41 = tpu.matmul %7, %40, %cst_13 {dimension_numbers = #tpu.dot_dimension_numbers<[1], [0], [0], [1], [0, 0, 1, 1], [], []>} : vector<16x72xbf16>, vector<72x512xbf16>, vector<16x512xf32> -> vector<16x512xf32>
    %42 = vector.broadcast %8 : vector<16x1xf32> to vector<16x512xf32>
    %43 = arith.addf %41, %42 : vector<16x512xf32>
    %cst_14 = arith.constant 0.000000e+00 : f32
    %44 = vector.broadcast %cst_14 : f32 to vector<16x512xf32>
    %45 = arith.cmpf ogt, %43, %44 : vector<16x512xf32>
    %cst_15 = arith.constant 1.000000e-01 : f32
    %46 = vector.broadcast %cst_15 : f32 to vector<16x512xf32>
    %47 = arith.mulf %46, %43 : vector<16x512xf32>
    %48 = arith.select %45, %43, %47 : vector<16x512xi1>, vector<16x512xf32>
    %49 = arith.truncf %48 : vector<16x512xf32> to vector<16x512xbf16>
    %cst_16 = arith.constant dense<0.000000e+00> : vector<8x512xf32>
    %50 = tpu.matmul %5, %49, %cst_16 {dimension_numbers = #tpu.dot_dimension_numbers<[1], [0], [0], [1], [0, 0, 1, 1], [], []>} : vector<8x16xbf16>, vector<16x512xbf16>, vector<8x512xf32> -> vector<8x512xf32>
    %51 = vector.broadcast %6 : vector<8x1xf32> to vector<8x512xf32>
    %52 = arith.addf %50, %51 : vector<8x512xf32>
    %cst_17 = arith.constant 0.000000e+00 : f32
    %53 = vector.broadcast %cst_17 : f32 to vector<8x512xf32>
    %54 = arith.cmpf ogt, %52, %53 : vector<8x512xf32>
    %cst_18 = arith.constant 1.000000e-01 : f32
    %55 = vector.broadcast %cst_18 : f32 to vector<8x512xf32>
    %56 = arith.mulf %55, %52 : vector<8x512xf32>
    %57 = arith.select %54, %52, %56 : vector<8x512xi1>, vector<8x512xf32>
    %58 = arith.truncf %57 : vector<8x512xf32> to vector<8x512xbf16>
    %59 = arith.extf %58 : vector<8x512xbf16> to vector<8x512xf32>
    %60 = vector.broadcast %1 : vector<1x512xf32> to vector<8x512xf32>
    %61 = arith.mulf %59, %60 : vector<8x512xf32>
    %62 = vector.broadcast %2 : vector<1x512xf32> to vector<8x512xf32>
    %63 = arith.mulf %59, %62 : vector<8x512xf32>
    %c17_i32_19 = arith.constant 17 : i32
    %64 = tpu.dynamic_rotate %61 by %c17_i32_19 dim 1 : vector<8x512xf32>, i32 -> vector<8x512xf32>
    %c16_i32_20 = arith.constant 16 : i32
    %65 = tpu.dynamic_rotate %59 by %c16_i32_20 dim 1 : vector<8x512xf32>, i32 -> vector<8x512xf32>
    %c15_i32_21 = arith.constant 15 : i32
    %66 = tpu.dynamic_rotate %63 by %c15_i32_21 dim 1 : vector<8x512xf32>, i32 -> vector<8x512xf32>
    %67 = tpu.concatenate %64, %65, %66 in 0 : vector<8x512xf32>, vector<8x512xf32>, vector<8x512xf32> -> vector<24x512xf32>
    %68 = vector.broadcast %3 : vector<1x512xf32> to vector<24x512xf32>
    %69 = arith.mulf %67, %68 : vector<24x512xf32>
    %c1_i32_22 = arith.constant 1 : i32
    %70 = tpu.dynamic_rotate %61 by %c1_i32_22 dim 1 : vector<8x512xf32>, i32 -> vector<8x512xf32>
    %c511_i32_23 = arith.constant 511 : i32
    %71 = tpu.dynamic_rotate %63 by %c511_i32_23 dim 1 : vector<8x512xf32>, i32 -> vector<8x512xf32>
    %72 = tpu.concatenate %70, %59, %71 in 0 : vector<8x512xf32>, vector<8x512xf32>, vector<8x512xf32> -> vector<24x512xf32>
    %c497_i32_24 = arith.constant 497 : i32
    %73 = tpu.dynamic_rotate %61 by %c497_i32_24 dim 1 : vector<8x512xf32>, i32 -> vector<8x512xf32>
    %c496_i32_25 = arith.constant 496 : i32
    %74 = tpu.dynamic_rotate %59 by %c496_i32_25 dim 1 : vector<8x512xf32>, i32 -> vector<8x512xf32>
    %c495_i32_26 = arith.constant 495 : i32
    %75 = tpu.dynamic_rotate %63 by %c495_i32_26 dim 1 : vector<8x512xf32>, i32 -> vector<8x512xf32>
    %76 = tpu.concatenate %73, %74, %75 in 0 : vector<8x512xf32>, vector<8x512xf32>, vector<8x512xf32> -> vector<24x512xf32>
    %77 = vector.broadcast %4 : vector<1x512xf32> to vector<24x512xf32>
    %78 = arith.mulf %76, %77 : vector<24x512xf32>
    %79 = tpu.concatenate %69, %72, %78 in 0 : vector<24x512xf32>, vector<24x512xf32>, vector<24x512xf32> -> vector<72x512xf32>
    %80 = arith.truncf %79 : vector<72x512xf32> to vector<72x512xbf16>
    %cst_27 = arith.constant dense<0.000000e+00> : vector<16x512xf32>
    %81 = tpu.matmul %7, %80, %cst_27 {dimension_numbers = #tpu.dot_dimension_numbers<[1], [0], [0], [1], [0, 0, 1, 1], [], []>} : vector<16x72xbf16>, vector<72x512xbf16>, vector<16x512xf32> -> vector<16x512xf32>
    %82 = vector.broadcast %8 : vector<16x1xf32> to vector<16x512xf32>
    %83 = arith.addf %81, %82 : vector<16x512xf32>
    %cst_28 = arith.constant 0.000000e+00 : f32
    %84 = vector.broadcast %cst_28 : f32 to vector<16x512xf32>
    %85 = arith.cmpf ogt, %83, %84 : vector<16x512xf32>
    %cst_29 = arith.constant 1.000000e-01 : f32
    %86 = vector.broadcast %cst_29 : f32 to vector<16x512xf32>
    %87 = arith.mulf %86, %83 : vector<16x512xf32>
    %88 = arith.select %85, %83, %87 : vector<16x512xi1>, vector<16x512xf32>
    %89 = arith.truncf %88 : vector<16x512xf32> to vector<16x512xbf16>
    %cst_30 = arith.constant dense<0.000000e+00> : vector<8x512xf32>
    %90 = tpu.matmul %5, %89, %cst_30 {dimension_numbers = #tpu.dot_dimension_numbers<[1], [0], [0], [1], [0, 0, 1, 1], [], []>} : vector<8x16xbf16>, vector<16x512xbf16>, vector<8x512xf32> -> vector<8x512xf32>
    %91 = vector.broadcast %6 : vector<8x1xf32> to vector<8x512xf32>
    %92 = arith.addf %90, %91 : vector<8x512xf32>
    %cst_31 = arith.constant 0.000000e+00 : f32
    %93 = vector.broadcast %cst_31 : f32 to vector<8x512xf32>
    %94 = arith.cmpf ogt, %92, %93 : vector<8x512xf32>
    %cst_32 = arith.constant 1.000000e-01 : f32
    %95 = vector.broadcast %cst_32 : f32 to vector<8x512xf32>
    %96 = arith.mulf %95, %92 : vector<8x512xf32>
    %97 = arith.select %94, %92, %96 : vector<8x512xi1>, vector<8x512xf32>
    %98 = arith.truncf %97 : vector<8x512xf32> to vector<8x512xbf16>
    %c0_33 = arith.constant 0 : index
    %c0_34 = arith.constant 0 : index
    %99 = vector.load %arg7[%c0_33, %c0_34] : memref<8x512xbf16, #tpu.memory_space<vmem>>, vector<8x512xbf16>
    tpu.vector_store %arg7[%c0_33, %c0_34], %98 {strides = array<i32>} : memref<8x512xbf16, #tpu.memory_space<vmem>>, vector<8x512xbf16>,
    return
  }
  func.func @transform_0(%arg0: i32) -> (i32, i32) {
    %c0_i32 = arith.constant 0 : i32
    %c0_i32_0 = arith.constant 0 : i32
    return %c0_i32, %arg0 : i32, i32
  }
  func.func @transform_1(%arg0: i32) -> (i32, i32) {
    %c0_i32 = arith.constant 0 : i32
    %c0_i32_0 = arith.constant 0 : i32
    %c0_i32_1 = arith.constant 0 : i32
    return %c0_i32, %c0_i32_0 : i32, i32
  }
  func.func @transform_2(%arg0: i32) -> (i32, i32) {
    %c0_i32 = arith.constant 0 : i32
    %c0_i32_0 = arith.constant 0 : i32
    %c0_i32_1 = arith.constant 0 : i32
    return %c0_i32, %c0_i32_0 : i32, i32
  }
  func.func @transform_3(%arg0: i32) -> (i32, i32) {
    %c0_i32 = arith.constant 0 : i32
    %c0_i32_0 = arith.constant 0 : i32
    %c0_i32_1 = arith.constant 0 : i32
    return %c0_i32, %c0_i32_0 : i32, i32
  }
  func.func @transform_4(%arg0: i32) -> (i32, i32) {
    %c0_i32 = arith.constant 0 : i32
    %c0_i32_0 = arith.constant 0 : i32
    %c0_i32_1 = arith.constant 0 : i32
    return %c0_i32, %c0_i32_0 : i32, i32
  }
  func.func @transform_5(%arg0: i32) -> (i32, i32) {
    %c0_i32 = arith.constant 0 : i32
    %c0_i32_0 = arith.constant 0 : i32
    %c0_i32_1 = arith.constant 0 : i32
    return %c0_i32, %c0_i32_0 : i32, i32
  }
  func.func @transform_6(%arg0: i32) -> (i32, i32) {
    %c0_i32 = arith.constant 0 : i32
    %c0_i32_0 = arith.constant 0 : i32
    return %c0_i32, %arg0 : i32, i32
  }
}

</mosaic_0001>

<bundles_post_ra>
// kernel: conv5_forward.1
= control target key start
LH: loop header
LB: loop body
LE: loop exit
PB: predicated region body
PF: predicated region fallthrough
CT: control target
= control target key end

     0   :  { %v1231_v1 = vmov 0   ;;  %vm61_vm0 = vcmask 130048   ;;  %v169_v8 = vlaneseq  ;;  %s1233_s11 = smov 112   ;;  %s1234_s12 = smov 17   ;;  %vm1804_vm13 = vcmask 1043456   ;;  %s1796_s0 = inlined_call_operand.vmem [shape: bf16[16,512], index: 0, kind: input, shape index: {}]   ;;  %s1797_s3 = inlined_call_operand.vmem [shape: f32[8,1], index: 3, kind: input, shape index: {}]   ;;  %s1798_s2 = inlined_call_operand.vmem [shape: bf16[8,16], index: 2, kind: input, shape index: {}]   ;;  %s1799_s1 = inlined_call_operand.vmem [shape: f32[4,512], index: 1, kind: input, shape index: {}]   ;;  %s1800_s4 = inlined_call_operand.vmem [shape: bf16[16,72], index: 4, kind: input, shape index: {}]   ;;  %s1801_s5 = inlined_call_operand.vmem [shape: f32[16,1], index: 5, kind: input, shape index: {}]   ;;  %s1802_s6 = inlined_call_operand.vmem [shape: bf16[8,512], index: 6, kind: output, shape index: {}]  }
   0x1   :  { %v1223_v0 = vld [vmem:[%s1796_s0 + $0x4] ss:$16 sps:$4 sm:$0xff]   ;;  %97 = vmatprep.mubr.bf16.mxu0 %v1231_v1  ;;  %138 = vmatprep.mubr.bf16.mxu1 %v1231_v1  ;;  %v1225_v2 = vld [vmem:[%s1796_s0 + $0xc] ss:$16 sps:$4 sm:$0xff]   ;;  %v1227_v3 = vld [vmem:[%s1796_s0] ss:$16 sps:$4 sm:$0xff]  }
   0x2   :  { %1141 = vset.pattern.permute.xlu0 %v1231_v1  ;;  %1182 = vset.pattern.permute.xlu1 %v1231_v1  ;;  %v1228_v4 = vld [vmem:[%s1796_s0 + $0x8] ss:$16 sps:$4 sm:$0xff]   ;;  %v27_v5 = vld [vmem:[%s1797_s3] sm:$0xff]  ;;  %v1312_v19 = vshrl.u32 %v169_v8, 7  ;;  %s1235_s13 = smov 15   ;;  %s1236_s14 = smov 113  }
   0x3   :  { %65 = vmatprep.subr.bf16.mxu0 %v1223_v0  ;;  %106 = vmatprep.subr.bf16.mxu1 %v1225_v2  ;;  %v1297_v6 = vld [vmem:[%s1798_s2] sm:$0xf]  ;;  %v1322_v37 = vld [vmem:[%s1799_s1 + $0x8] sm:$0xff]  ;;  %s1237_s15 = smov 1   ;;  %s1238_s16 = smov 127   ;;  %vm1803_vm14 = vcmask 588800  }
   0x4   :  { %66 = vmatpush1.bf16.msra.mxu0 %v1227_v3  ;;  %107 = vmatpush1.bf16.msra.mxu1 %v1228_v4  ;;  %v171_v34 = vsub.s32 0, %v1312_v19  ;;  %v1327_v38 = vld [vmem:[%s1799_s1] sm:$0xff]  ;;  %v211_v41 = vsub.s32 1, %v1312_v19  ;;  %v175_v42 = vsub.s32 4, %v1312_v19  ;;  %s1232_s1 = smov 16   ;;  %v215_v49 = vsub.s32 5, %v1312_v19 }
   0x5   :  { %38 = vperm.xlu0 %1141, %v27_v5   ;;  %s1239_s17 = smov 111  }
   0x6   :  { %v180_v45 = vrot.slane %v1322_v37, %v171_v34  ;;  %v172_v46 = vrot.slane %v1327_v38, %v171_v34  ;;  %v212_v47 = vrot.slane %v1327_v38, %v211_v41  ;;  %v184_v48 = vrot.slane %v1322_v37, %v175_v42 }
   0x7   :  { %1113 = vmatmul.mubr.msk.bf16.vlgmr.msra.gmra.mrb[0].mxu0 %vm61_vm0, %v1297_v6  ;;  %1114 = vmatmul.mubr.msk.bf16.vlgmr.msra.gmra.mrb[0].mxu1 %vm61_vm0, %v1297_v6  ;;  %v220_v52 = vrot.slane %v1322_v37, %v211_v41  ;;  %v216_v53 = vrot.slane %v1327_v38, %v215_v49  ;;  %v224_v58 = vrot.slane %v1322_v37, %v215_v49 }
   0x8   :  { %535 = vmatprep.mubr.bf16.mxu0 %v1231_v1  ;;  %578 = vmatprep.mubr.bf16.mxu1 %v1231_v1  ;;  %v1346_v50 = vrot.slane %v180_v45, %v171_v34  ;;  %v1348_v51 = vrot.slane %v172_v46, %v171_v34  ;;  %v1358_v56 = vrot.slane %v212_v47, %v211_v41 }
   0x9   :  { %v1360_v57 = vrot.slane %v184_v48, %v171_v34  ;;  %v1369_v61 = vrot.slane %v220_v52, %v211_v41  ;;  %v1371_v62 = vrot.slane %v216_v53, %v211_v41  ;;  %v1379_v2 = vrot.slane %v224_v58, %v211_v41 }
   0xa   :  { %v176_v4 = vrot.slane %v1327_v38, %v175_v42  ;;  %v405_v41 = vsub.s32 3, %v1312_v19  ;;  %v409_v42 = vsub.s32 7, %v1312_v19 }
   0xc   :  { %v406_v52 = vrot.slane %v1327_v38, %v405_v41  ;;  %v410_v53 = vrot.slane %v1327_v38, %v409_v42 }
  0x84   :  { %v1305_v7 = vpop.permute.xlu0 %38 }
  0xda   :  { %v99_v9 = vpop.f32.mrb[0].mxu0  ;;  %v140_v10 = vpop.f32.mrb[0].mxu1 }
  0xdb   :  { %v100_v11 = vadd.f32 %v99_v9, %v1305_v7  ;;  %v141_v12 = vadd.f32 %v140_v10, %v1305_v7  ;;  %v101_v13 = vpop.f32.mrb[1].mxu0  ;;  %v142_v14 = vpop.f32.mrb[1].mxu1  ;;  %v1388_v9 = vrot.slane %v176_v4, %v171_v34 }
  0xdc   :  { %v102_v15 = vadd.f32 %v101_v13, %v1305_v7  ;;  %v143_v16 = vadd.f32 %v142_v14, %v1305_v7  ;;  %v103_v17 = vpop.f32.mrb[2].mxu0  ;;  %v144_v18 = vpop.f32.mrb[2].mxu1  ;;  %v31_v14 = vld [vmem:[%s1801_s5 + $0x8] sm:$0xff] }
  0xdd   :  { %vm147_vm1 = vcmp.gt.f32.partialorder %v100_v11, 0.0  ;;  %v151_v20 = vmul.f32 0.1, %v100_v11  ;;  %vm149_vm2 = vcmp.gt.f32.partialorder %v141_v12, 0.0  ;;  %v153_v21 = vmul.f32 0.1, %v141_v12 }
  0xde   :  { %vm148_vm3 = vcmp.gt.f32.partialorder %v102_v15, 0.0  ;;  %v152_v22 = vmul.f32 0.1, %v102_v15  ;;  %vm150_vm4 = vcmp.gt.f32.partialorder %v143_v16, 0.0  ;;  %v154_v23 = vmul.f32 0.1, %v143_v16 }
  0xdf   :  { %v155_v24 = vsel %vm147_vm1, %v100_v11, %v151_v20  ;;  %v157_v25 = vsel %vm149_vm2, %v141_v12, %v153_v21  ;;  %v104_v26 = vpop.f32.mrb[3].mxu0  ;;  %v145_v27 = vpop.f32.mrb[3].mxu1  ;;  %v296_v18 = vsub.s32 6, %v1312_v19  ;;  %v1412_v20 = vand.u32 127, %v169_v8 }
  0xe0   :  { %v159_v28 = vpack.c.bf16 %v155_v24, %v155_v24  ;;  %v161_v29 = vpack.c.bf16 %v157_v25, %v157_v25  ;;  %v156_v30 = vsel %vm148_vm3, %v102_v15, %v152_v22  ;;  %v158_v31 = vsel %vm150_vm4, %v143_v16, %v154_v23  ;;  %v30_v15 = vld [vmem:[%s1801_s5] sm:$0xff] }
  0xe1   :  { %v160_v32 = vpack.c.bf16 %v156_v30, %v156_v30  ;;  %v162_v33 = vpack.c.bf16 %v158_v31, %v158_v31  ;;  %v305_v23 = vrot.slane %v1322_v37, %v296_v18  ;;  %vm272_vm5 = vcmp.lt.s32.totalorder %v1412_v20, 16 }
  0xe2   :  { %v1315_v35 = vunpack.c.l.bf16 %v159_v28  ;;  %v1317_v36 = vunpack.c.l.bf16 %v161_v29  ;;  %v292_v28 = vsub.s32 2, %v1312_v19  ;;  %vm259_vm6 = vcmp.lt.s32.totalorder %v1412_v20, 17 }
  0xe3   :  { %v1329_v39 = vunpack.c.l.bf16 %v160_v32  ;;  %v1331_v40 = vunpack.c.l.bf16 %v162_v33  ;;  %v297_v47 = vrot.slane %v1327_v38, %v296_v18  ;;  %vm385_vm7 = vcmp.lt.s32.totalorder %v1412_v20, 112 }
  0xe4   :  { %v207_v54 = vmul.f32 %v1346_v50, %v1317_v36  ;;  %v205_v55 = vmul.f32 %v1348_v51, %v1315_v35  ;;  %v245_v59 = vmul.f32 %v1358_v56, %v1315_v35  ;;  %v247_v63 = vmul.f32 %v1369_v61, %v1317_v36 }
  0xe5   :  { %v1147_v43 = vpack.i.bf16 %v1331_v40, %v1317_v36  ;;  %v1142_v44 = vpack.i.bf16 %v1329_v39, %v1315_v35  ;;  %v208_v60 = vmul.f32 %v1360_v57, %v1331_v40  ;;  %v246_v0 = vmul.f32 %v1371_v62, %v1329_v39 }
  0xe6   :  { %v248_v3 = vmul.f32 %v1379_v2, %v1331_v40  ;;  %v206_v10 = vmul.f32 %v1388_v9, %v1329_v39  ;;  %v1426_v8 = vrot.slane %v305_v23, %v292_v28  ;;  %v293_v46 = vrot.slane %v1327_v38, %v292_v28 }
  0xe7   :  { %1148 = vrot.lane.b32.xlu0 %v1147_v43, %s1232_s1  ;;  %1143 = vrot.lane.b32.xlu1 %v1142_v44, %s1232_s1  ;;  %v1167_v5 = vpack.i.bf16 %v208_v60, %v207_v54  ;;  %v1172_v13 = vpack.i.bf16 %v246_v0, %v245_v59  ;;  %v301_v48 = vrot.slane %v1322_v37, %v292_v28  ;;  %vm285_vm8 = vcmp.lt.s32.totalorder %v1412_v20, 15 }
  0xe8   :  { %v1177_v11 = vpack.i.bf16 %v248_v3, %v247_v63  ;;  %v1162_v12 = vpack.i.bf16 %v206_v10, %v205_v55  ;;  %v1447_v19 = vrot.slane %v293_v46, %v292_v28  ;;  %vm346_vm9 = vcmp.lt.s32.totalorder %v1412_v20, 1 }
  0xe9   :  { %v1455_v4 = vrot.slane %v301_v48, %v292_v28  ;;  %vm359_vm10 = vcmp.lt.s32.totalorder %v1412_v20, 127  ;;  %vm372_vm11 = vcmp.lt.s32.totalorder %v1412_v20, 113  ;;  %vm1805_vm12 = vcmp.lt.s32.totalorder %v1412_v20, 111 }
  0xeb   :  { %1158 = vrot.lane.b32.xlu0 %v1147_v43, %s1233_s11  ;;  %1153 = vrot.lane.b32.xlu1 %v1142_v44, %s1233_s11 }
  0xef   :  { %253 = vrot.lane.b32.xlu1 %v207_v54, %s1234_s12  ;;  %249 = vrot.lane.b32.xlu0 %v205_v55, %s1234_s12 }
  0xf3   :  { %277 = vrot.lane.b32.xlu1 %v245_v59, %s1235_s13  ;;  %255 = vrot.lane.b32.xlu0 %v208_v60, %s1234_s12 }
  0xf7   :  { %281 = vrot.lane.b32.xlu1 %v247_v63, %s1235_s13  ;;  %279 = vrot.lane.b32.xlu0 %v246_v0, %s1235_s13 }
  0xfb   :  { %364 = vrot.lane.b32.xlu1 %v205_v55, %s1236_s14  ;;  %283 = vrot.lane.b32.xlu0 %v248_v3, %s1235_s13 }
  0xff   :  { %368 = vrot.lane.b32.xlu1 %v207_v54, %s1236_s14  ;;  %1168 = vrot.lane.b32.xlu0 %v1167_v5, %s1237_s15  ;;  %v1460_v5 = vrot.slane %v406_v52, %v405_v41 }
 0x103   :  { %251 = vrot.lane.b32.xlu1 %v206_v10, %s1234_s12  ;;  %1178 = vrot.lane.b32.xlu0 %v1177_v11, %s1238_s16 }
 0x107   :  { %1163 = vrot.lane.b32.xlu1 %v1162_v12, %s1237_s15  ;;  %366 = vrot.lane.b32.xlu0 %v206_v10, %s1236_s14  ;;  %v1462_v10 = vrot.slane %v410_v53, %v405_v41 }
 0x10b   :  { %1173 = vrot.lane.b32.xlu1 %v1172_v13, %s1238_s16  ;;  %370 = vrot.lane.b32.xlu0 %v208_v60, %s1236_s14  ;;  %v418_v60 = vrot.slane %v1322_v37, %v409_v42 }
 0x10d   :  { %v1478_v18 = vrot.slane %v418_v60, %v405_v41 }
 0x10f   :  { %390 = vrot.lane.b32.xlu1 %v245_v59, %s1239_s17  ;;  %392 = vrot.lane.b32.xlu0 %v246_v0, %s1239_s17  ;;  %v414_v59 = vrot.slane %v1322_v37, %v405_v41 }
 0x113   :  { %394 = vrot.lane.b32.xlu1 %v247_v63, %s1239_s17  ;;  %396 = vrot.lane.b32.xlu0 %v248_v3, %s1239_s17  ;;  %v1453_v3 = vrot.slane %v297_v47, %v292_v28 }
 0x117   :  { %478 = vperm.xlu0 %1141, %v31_v14   ;;  %473 = vperm.xlu1 %1182, %v30_v15  }
 0x159   :  { %v1149_v16 = vpop.permute.xlu0 %1148  ;;  %v1144_v17 = vpop.permute.xlu1 %1143 }
 0x15a   :  { %v1151_v24 = vunpack.i.h.bf16 %v1149_v16  ;;  %v1150_v25 = vunpack.i.l.bf16 %v1149_v16  ;;  %v1146_v49 = vunpack.i.h.bf16 %v1144_v17  ;;  %v1145_v54 = vunpack.i.l.bf16 %v1144_v17 }
 0x15b   :  { %v1476_v17 = vrot.slane %v414_v59, %v405_v41 }
 0x15c   :  { %v273_v29 = vsel %vm272_vm5, %v1150_v25, %v1151_v24  ;;  %v274_v38 = vsel %vm272_vm5, %v1146_v49, %v1150_v25  ;;  %v276_v37 = vsel %vm272_vm5, %v1151_v24, %v1145_v54  ;;  %v275_v16 = vsel %vm272_vm5, %v1145_v54, %v1146_v49 }
 0x15d   :  { %v1414_v21 = vpop.permute.xlu0 %1158  ;;  %v1416_v22 = vpop.permute.xlu1 %1153  ;;  %v333_v34 = vmul.f32 %v1426_v8, %v273_v29  ;;  %v330_v24 = vmul.f32 %v1447_v19, %v276_v37  ;;  %v332_v28 = vmul.f32 %v1455_v4, %v274_v38  ;;  %v331_v41 = vmul.f32 %v1453_v3, %v275_v16 }
 0x15e   :  { %v1160_v63 = vunpack.i.l.bf16 %v1414_v21  ;;  %v1156_v0 = vunpack.i.h.bf16 %v1416_v22  ;;  %v1161_v11 = vunpack.i.h.bf16 %v1414_v21  ;;  %v1155_v12 = vunpack.i.l.bf16 %v1416_v22 }
 0x160   :  { %v387_v21 = vsel %vm385_vm7, %v1156_v0, %v1160_v63  ;;  %v1489_v29 = vsel %vm385_vm7, %v1160_v63, %v1161_v11  ;;  %v389_v42 = vsel %vm385_vm7, %v1161_v11, %v1155_v12 }
 0x161   :  { %v1420_v26 = vpop.permute.xlu1 %253  ;;  %v1422_v27 = vpop.permute.xlu0 %249  ;;  %v1507_v47 = vmul.f32 %v1462_v10, %v387_v21 }
 0x165   :  { %v1430_v30 = vpop.permute.xlu1 %277  ;;  %v256_v31 = vpop.permute.xlu0 %255 }
 0x166   :  { %v260_v32 = vsel %vm259_vm6, %v1420_v26, %v256_v31  ;;  %v263_v13 = vsel %vm259_vm6, %v256_v31, %v1422_v27  ;;  %v1493_v31 = vsel %vm385_vm7, %v1155_v12, %v1156_v0 }
 0x167   :  { %v329_v33 = vmul.f32 %v1426_v8, %v260_v32  ;;  %v326_v25 = vmul.f32 %v1447_v19, %v263_v13 }
 0x169   :  { %v282_v43 = vpop.permute.xlu1 %281  ;;  %v280_v44 = vpop.permute.xlu0 %279  ;;  %v454_v45 = vpack.c.bf16 %v333_v34, %v329_v33  ;;  %v451_v54 = vpack.c.bf16 %v330_v24, %v326_v25 }
 0x16a   :  { %v288_v48 = vsel %vm285_vm8, %v1430_v30, %v280_v44 }
 0x16b   :  { %546 = vmatprep.subr.bf16.mxu1 %v454_v45  ;;  %v335_v12 = vmul.f32 %v1453_v3, %v288_v48 }
 0x16d   :  { %v1444_v55 = vpop.permute.xlu1 %364  ;;  %v284_v58 = vpop.permute.xlu0 %283 }
 0x16e   :  { %v286_v32 = vsel %vm285_vm8, %v282_v43, %v284_v58 }
 0x16f   :  { %v337_v59 = vmul.f32 %v1426_v8, %v286_v32 }
 0x171   :  { %v1471_v14 = vpop.permute.xlu1 %368  ;;  %v1169_v15 = vpop.permute.xlu0 %1168 }
 0x172   :  { %v1171_v22 = vunpack.i.h.bf16 %v1169_v15  ;;  %v1170_v23 = vunpack.i.l.bf16 %v1169_v15 }
 0x174   :  { %v347_v53 = vsel %vm346_vm9, %v1170_v23, %v1171_v22 }
 0x175   :  { %v252_v33 = vpop.permute.xlu1 %251  ;;  %v1179_v34 = vpop.permute.xlu0 %1178  ;;  %v458_v16 = vpack.c.bf16 %v347_v53, %v337_v59 }
 0x176   :  { %v261_v45 = vsel %vm259_vm6, %v252_v33, %v1420_v26  ;;  %v262_v46 = vsel %vm259_vm6, %v1422_v27, %v252_v33  ;;  %v287_v26 = vsel %vm285_vm8, %v280_v44, %v282_v43  ;;  %v289_v27 = vsel %vm285_vm8, %v284_v58, %v1430_v30 }
 0x177   :  { %v327_v49 = vmul.f32 %v1453_v3, %v262_v46  ;;  %v328_v52 = vmul.f32 %v1455_v4, %v261_v45  ;;  %v1181_v63 = vunpack.i.h.bf16 %v1179_v34  ;;  %v1180_v0 = vunpack.i.l.bf16 %v1179_v34 }
 0x178   :  { %v336_v21 = vmul.f32 %v1455_v4, %v287_v26  ;;  %v334_v43 = vmul.f32 %v1447_v19, %v289_v27  ;;  %v446_v26 = vmul.f32 %v1478_v18, %v389_v42 }
 0x179   :  { %v453_v60 = vpack.c.bf16 %v332_v28, %v328_v52  ;;  %v1164_v38 = vpop.permute.xlu1 %1163  ;;  %v367_v37 = vpop.permute.xlu0 %366  ;;  %v452_v11 = vpack.c.bf16 %v331_v41, %v327_v49  ;;  %v360_v25 = vsel %vm359_vm10, %v1180_v0, %v1181_v63 }
 0x17a   :  { %v1166_v13 = vunpack.i.h.bf16 %v1164_v38  ;;  %v1165_v15 = vunpack.i.l.bf16 %v1164_v38  ;;  %v374_v30 = vsel %vm372_vm11, %v367_v37, %v1471_v14 }
 0x17b   :  { %503 = vmatprep.subr.bf16.mxu0 %v452_v11  ;;  %547 = vmatpush1.bf16.msra.mxu1 %v453_v60  ;;  %v440_v48 = vmul.f32 %v1462_v10, %v374_v30  ;;  %v461_v11 = vpack.c.bf16 %v360_v25, %v1317_v36 }
 0x17c   :  { %v348_v44 = vsel %vm346_vm9, %v1166_v13, %v1170_v23  ;;  %v350_v58 = vsel %vm346_vm9, %v1171_v22, %v1165_v15  ;;  %504 = vmatpush1.bf16.msra.mxu0 %v451_v54  ;;  %548 = vmatprep.subr.bf16.mxu1 %v458_v16  ;;  %v349_v24 = vsel %vm346_vm9, %v1165_v15, %v1166_v13 }
 0x17d   :  { %v455_v28 = vpack.c.bf16 %v350_v58, %v334_v43  ;;  %v457_v32 = vpack.c.bf16 %v348_v44, %v336_v21  ;;  %v1174_v33 = vpop.permute.xlu1 %1173  ;;  %v371_v34 = vpop.permute.xlu0 %370  ;;  %v456_v41 = vpack.c.bf16 %v349_v24, %v335_v12  ;;  %v375_v23 = vsel %vm372_vm11, %v1444_v55, %v367_v37 }
 0x17e   :  { %v1176_v45 = vunpack.i.h.bf16 %v1174_v33  ;;  %v1175_v46 = vunpack.i.l.bf16 %v1174_v33  ;;  %v376_v22 = vsel %vm372_vm11, %v371_v34, %v1444_v55  ;;  %v373_v49 = vsel %vm372_vm11, %v1471_v14, %v371_v34  ;;  %v1585_v33 = vld [vmem:[%s1800_s4] sm:$0xff]  }
 0x17f   :  { %v442_v52 = vmul.f32 %v1478_v18, %v376_v22  ;;  %505 = vmatprep.subr.bf16.mxu0 %v456_v41  ;;  %549 = vmatpush1.bf16.msra.mxu1 %v457_v32  ;;  %v439_v14 = vmul.f32 %v1460_v5, %v375_v23  ;;  %v441_v12 = vmul.f32 %v1476_v17, %v373_v49 }
 0x180   :  { %v362_v53 = vsel %vm359_vm10, %v1175_v46, %v1176_v45  ;;  %506 = vmatpush1.bf16.msra.mxu0 %v455_v28  ;;  %v361_v54 = vsel %vm359_vm10, %v1176_v45, %v1180_v0  ;;  %v363_v55 = vsel %vm359_vm10, %v1181_v63, %v1175_v46  ;;  %v443_v0 = vmul.f32 %v1460_v5, %v1493_v31 }
 0x181   :  { %v459_v27 = vpack.c.bf16 %v362_v53, %v1315_v35  ;;  %v391_v59 = vpop.permute.xlu1 %390  ;;  %v393_v60 = vpop.permute.xlu0 %392  ;;  %v460_v38 = vpack.c.bf16 %v361_v54, %v1329_v39  ;;  %v462_v37 = vpack.c.bf16 %v363_v55, %v1331_v40  ;;  %v464_v35 = vpack.c.bf16 %v1507_v47, %v440_v48 }
 0x182   :  { %v401_v42 = vsel %vm1805_vm12, %v391_v59, %v393_v60  ;;  %v466_v13 = vpack.c.bf16 %v446_v26, %v442_v52  ;;  %v445_v39 = vmul.f32 %v1476_v17, %v1489_v29  ;;  %v463_v36 = vpack.c.bf16 %v443_v0, %v439_v14 }
 0x183   :  { %v447_v63 = vmul.f32 %v1460_v5, %v401_v42  ;;  %507 = vmatprep.subr.bf16.mxu0 %v460_v38  ;;  %550 = vmatprep.subr.bf16.mxu1 %v462_v37 }
 0x184   :  { %508 = vmatpush1.bf16.msra.mxu0 %v459_v27  ;;  %551 = vmatpush1.bf16.msra.mxu1 %v461_v11  ;;  %v465_v15 = vpack.c.bf16 %v445_v39, %v441_v12 }
 0x185   :  { %v395_v40 = vpop.permute.xlu1 %394  ;;  %v397_v31 = vpop.permute.xlu0 %396  ;;  %509 = vmatprep.subr.bf16.mxu0 %v464_v35  ;;  %552 = vmatprep.subr.bf16.mxu1 %v466_v13  ;;  %v467_v43 = vpack.c.bf16 %v447_v63, %v447_v63 }
 0x186   :  { %v400_v16 = vsel %vm1805_vm12, %v393_v60, %v395_v40  ;;  %v399_v21 = vsel %vm1805_vm12, %v395_v40, %v397_v31  ;;  %v402_v47 = vsel %vm1805_vm12, %v397_v31, %v391_v59 }
 0x187   :  { %v448_v29 = vmul.f32 %v1462_v10, %v400_v16  ;;  %v449_v30 = vmul.f32 %v1476_v17, %v399_v21  ;;  %v450_v44 = vmul.f32 %v1478_v18, %v402_v47  ;;  %v492_v28 = vsel %vm1804_vm13, %v467_v43, 0 }
 0x188   :  { %510 = vmatpush1.bf16.msra.mxu0 %v463_v36  ;;  %553 = vmatpush1.bf16.msra.mxu1 %v465_v15 }
 0x189   :  { %v468_v58 = vpack.c.bf16 %v448_v29, %v448_v29  ;;  %v469_v24 = vpack.c.bf16 %v449_v30, %v449_v30  ;;  %v470_v25 = vpack.c.bf16 %v450_v44, %v450_v44 }
 0x18b   :  { %1116 = vmatprep.subr.msk.bf16.mxu0 %vm1804_vm13, %v468_v58  ;;  %1118 = vmatprep.subr.msk.bf16.mxu1 %vm1804_vm13, %v470_v25  ;;  %v498_v32 = vsel %vm1804_vm13, %v469_v24, 0 }
 0x18c   :  { %512 = vmatpush1.bf16.msra.mxu0 %v492_v28  ;;  %555 = vmatpush1.bf16.msra.mxu1 %v498_v32 }
 0x18f   :  { %1117 = vmatmul.mubr.msk.bf16.vlgmr.msra.gmra.mrb[4].mxu0 %vm1803_vm14, %v1585_v33  ;;  %1119 = vmatmul.mubr.msk.bf16.vlgmr.msra.gmra.mrb[4].mxu1 %vm1803_vm14, %v1585_v33 }
 0x190   :  { %649 = vmatprep.mubr.bf16.mxu0 %v1231_v1  ;;  %690 = vmatprep.mubr.bf16.mxu1 %v1231_v1 }
 0x196   :  { %v1593_v34 = vpop.permute.xlu1 %473  ;;  %v1599_v14 = vpop.permute.xlu0 %478 }
 0x262   :  { %v537_v41 = vpop.f32.mrb[4].mxu0  ;;  %v580_v23 = vpop.f32.mrb[4].mxu1 }
 0x263   :  { %v538_v45 = vadd.f32 %v537_v41, %v1593_v34  ;;  %v581_v46 = vadd.f32 %v580_v23, %v1593_v34  ;;  %v539_v22 = vpop.f32.mrb[5].mxu0  ;;  %v582_v48 = vpop.f32.mrb[5].mxu1 }
 0x264   :  { %v540_v49 = vadd.f32 %v539_v22, %v1593_v34  ;;  %v583_v52 = vadd.f32 %v582_v48, %v1593_v34  ;;  %v541_v53 = vpop.f32.mrb[6].mxu0  ;;  %v584_v54 = vpop.f32.mrb[6].mxu1 }
 0x265   :  { %vm589_vm15 = vcmp.gt.f32.partialorder %v538_v45, 0.0  ;;  %v597_v55 = vmul.f32 0.1, %v538_v45  ;;  %vm591_vm1 = vcmp.gt.f32.partialorder %v581_v46, 0.0  ;;  %v599_v26 = vmul.f32 0.1, %v581_v46 }
 0x266   :  { %vm590_vm2 = vcmp.gt.f32.partialorder %v540_v49, 0.0  ;;  %v598_v27 = vmul.f32 0.1, %v540_v49  ;;  %vm592_vm3 = vcmp.gt.f32.partialorder %v583_v52, 0.0  ;;  %v600_v59 = vmul.f32 0.1, %v583_v52 }
 0x267   :  { %v542_v60 = vadd.f32 %v541_v53, %v1599_v14  ;;  %v585_v38 = vadd.f32 %v584_v54, %v1599_v14  ;;  %v543_v37 = vpop.f32.mrb[7].mxu0  ;;  %v586_v11 = vpop.f32.mrb[7].mxu1  ;;  %v605_v0 = vsel %vm589_vm15, %v538_v45, %v597_v55  ;;  %v607_v12 = vsel %vm591_vm1, %v581_v46, %v599_v26 }
 0x268   :  { %v544_v42 = vadd.f32 %v543_v37, %v1599_v14  ;;  %v587_v63 = vadd.f32 %v586_v11, %v1599_v14  ;;  %v606_v15 = vsel %vm590_vm2, %v540_v49, %v598_v27  ;;  %v608_v16 = vsel %vm592_vm3, %v583_v52, %v600_v59 }
 0x269   :  { %vm593_vm4 = vcmp.gt.f32.partialorder %v542_v60, 0.0  ;;  %v601_v35 = vmul.f32 0.1, %v542_v60  ;;  %vm595_vm14 = vcmp.gt.f32.partialorder %v585_v38, 0.0  ;;  %v603_v13 = vmul.f32 0.1, %v585_v38 }
 0x26a   :  { %vm594_vm13 = vcmp.gt.f32.partialorder %v544_v42, 0.0  ;;  %v602_v39 = vmul.f32 0.1, %v544_v42  ;;  %vm596_vm12 = vcmp.gt.f32.partialorder %v587_v63, 0.0  ;;  %v604_v36 = vmul.f32 0.1, %v587_v63 }
 0x26b   :  { %v609_v40 = vsel %vm593_vm4, %v542_v60, %v601_v35  ;;  %v611_v31 = vsel %vm595_vm14, %v585_v38, %v603_v13  ;;  %vm1814_vm2 = vcmask 588800  }
 0x26c   :  { %v613_v21 = vpack.c.bf16 %v609_v40, %v605_v0  ;;  %v615_v47 = vpack.c.bf16 %v611_v31, %v607_v12  ;;  %v610_v43 = vsel %vm594_vm13, %v544_v42, %v602_v39  ;;  %v612_v29 = vsel %vm596_vm12, %v587_v63, %v604_v36  ;;  %vm1815_vm3 = vmmov %vm1814_vm2 }
 0x26d   :  { %v614_v30 = vpack.c.bf16 %v610_v43, %v606_v15  ;;  %v616_v44 = vpack.c.bf16 %v612_v29, %v608_v16 }
 0x26f   :  { %617 = vmatprep.subr.bf16.mxu0 %v614_v30  ;;  %658 = vmatprep.subr.bf16.mxu1 %v616_v44 }
 0x270   :  { %618 = vmatpush1.bf16.msra.mxu0 %v613_v21  ;;  %659 = vmatpush1.bf16.msra.mxu1 %v615_v47 }
 0x273   :  { %1120 = vmatmul.mubr.msk.bf16.vlgmr.msra.gmra.mrb[8].mxu0 %vm61_vm0, %v1297_v6  ;;  %1121 = vmatmul.mubr.msk.bf16.vlgmr.msra.gmra.mrb[8].mxu1 %vm61_vm0, %v1297_v6 }
 0x274   :  { %911 = vmatprep.mubr.bf16.mxu0 %v1231_v1  ;;  %954 = vmatprep.mubr.bf16.mxu1 %v1231_v1 }
 0x346   :  { %v651_v58 = vpop.f32.mrb[8].mxu0  ;;  %v692_v24 = vpop.f32.mrb[8].mxu1 }
 0x347   :  { %v652_v25 = vadd.f32 %v651_v58, %v1305_v7  ;;  %v693_v28 = vadd.f32 %v692_v24, %v1305_v7  ;;  %v653_v32 = vpop.f32.mrb[9].mxu0  ;;  %v694_v41 = vpop.f32.mrb[9].mxu1 }
 0x348   :  { %v654_v23 = vadd.f32 %v653_v32, %v1305_v7  ;;  %v695_v45 = vadd.f32 %v694_v41, %v1305_v7  ;;  %v655_v46 = vpop.f32.mrb[10].mxu0  ;;  %v696_v22 = vpop.f32.mrb[10].mxu1 }
 0x349   :  { %vm699_vm12 = vcmp.gt.f32.partialorder %v652_v25, 0.0  ;;  %v703_v6 = vmul.f32 0.1, %v652_v25  ;;  %vm701_vm13 = vcmp.gt.f32.partialorder %v693_v28, 0.0  ;;  %v705_v48 = vmul.f32 0.1, %v693_v28 }
 0x34a   :  { %vm700_vm14 = vcmp.gt.f32.partialorder %v654_v23, 0.0  ;;  %v704_v49 = vmul.f32 0.1, %v654_v23  ;;  %vm702_vm15 = vcmp.gt.f32.partialorder %v695_v45, 0.0  ;;  %v706_v52 = vmul.f32 0.1, %v695_v45 }
 0x34b   :  { %v707_v53 = vsel %vm699_vm12, %v652_v25, %v703_v6  ;;  %v709_v54 = vsel %vm701_vm13, %v693_v28, %v705_v48  ;;  %v656_v55 = vpop.f32.mrb[11].mxu0  ;;  %v697_v26 = vpop.f32.mrb[11].mxu1 }
 0x34c   :  { %v711_v27 = vpack.c.bf16 %v707_v53, %v707_v53  ;;  %v713_v59 = vpack.c.bf16 %v709_v54, %v709_v54  ;;  %v708_v60 = vsel %vm700_vm14, %v654_v23, %v704_v49  ;;  %v710_v38 = vsel %vm702_vm15, %v695_v45, %v706_v52 }
 0x34d   :  { %v712_v37 = vpack.c.bf16 %v708_v60, %v708_v60  ;;  %v714_v11 = vpack.c.bf16 %v710_v38, %v710_v38 }
 0x34e   :  { %v1617_v0 = vunpack.c.l.bf16 %v711_v27  ;;  %v1619_v12 = vunpack.c.l.bf16 %v713_v59 }
 0x34f   :  { %v1621_v42 = vunpack.c.l.bf16 %v712_v37  ;;  %v1623_v63 = vunpack.c.l.bf16 %v714_v11 }
 0x350   :  { %v719_v39 = vmul.f32 %v1617_v0, %v1348_v51  ;;  %v721_v31 = vmul.f32 %v1619_v12, %v1346_v50  ;;  %v725_v50 = vmul.f32 %v1619_v12, %v1369_v61 }
 0x351   :  { %v1183_v35 = vpack.i.bf16 %v1621_v42, %v1617_v0  ;;  %v1188_v13 = vpack.i.bf16 %v1623_v63, %v1619_v12  ;;  %v720_v36 = vmul.f32 %v1621_v42, %v1388_v9  ;;  %v722_v40 = vmul.f32 %v1623_v63, %v1360_v57 }
 0x352   :  { %v724_v51 = vmul.f32 %v1621_v42, %v1371_v62  ;;  %v723_v9 = vmul.f32 %v1617_v0, %v1358_v56  ;;  %v726_v57 = vmul.f32 %v1623_v63, %v1379_v2 }
 0x353   :  { %1184 = vrot.lane.b32.xlu1 %v1183_v35, %s1232_s1  ;;  %1189 = vrot.lane.b32.xlu0 %v1188_v13, %s1232_s1  ;;  %v1208_v15 = vpack.i.bf16 %v722_v40, %v721_v31  ;;  %v1203_v62 = vpack.i.bf16 %v720_v36, %v719_v39 }
 0x354   :  { %v1218_v56 = vpack.i.bf16 %v726_v57, %v725_v50  ;;  %v1213_v61 = vpack.i.bf16 %v724_v51, %v723_v9 }
 0x357   :  { %1194 = vrot.lane.b32.xlu1 %v1183_v35, %s1233_s11  ;;  %1199 = vrot.lane.b32.xlu0 %v1188_v13, %s1233_s11 }
 0x35b   :  { %727 = vrot.lane.b32.xlu1 %v719_v39, %s1234_s12  ;;  %729 = vrot.lane.b32.xlu0 %v720_v36, %s1234_s12 }
 0x35f   :  { %733 = vrot.lane.b32.xlu0 %v722_v40, %s1234_s12  ;;  %731 = vrot.lane.b32.xlu1 %v721_v31, %s1234_s12 }
 0x363   :  { %753 = vrot.lane.b32.xlu0 %v724_v51, %s1235_s13  ;;  %751 = vrot.lane.b32.xlu1 %v723_v9, %s1235_s13 }
 0x367   :  { %757 = vrot.lane.b32.xlu0 %v726_v57, %s1235_s13  ;;  %755 = vrot.lane.b32.xlu1 %v725_v50, %s1235_s13 }
 0x36b   :  { %1209 = vrot.lane.b32.xlu0 %v1208_v15, %s1237_s15  ;;  %799 = vrot.lane.b32.xlu1 %v719_v39, %s1236_s14 }
 0x36f   :  { %1219 = vrot.lane.b32.xlu0 %v1218_v56, %s1238_s16  ;;  %803 = vrot.lane.b32.xlu1 %v721_v31, %s1236_s14 }
 0x373   :  { %801 = vrot.lane.b32.xlu0 %v720_v36, %s1236_s14  ;;  %1204 = vrot.lane.b32.xlu1 %v1203_v62, %s1237_s15 }
 0x377   :  { %805 = vrot.lane.b32.xlu0 %v722_v40, %s1236_s14  ;;  %1214 = vrot.lane.b32.xlu1 %v1213_v61, %s1238_s16 }
 0x37b   :  { %825 = vrot.lane.b32.xlu0 %v724_v51, %s1239_s17  ;;  %823 = vrot.lane.b32.xlu1 %v723_v9, %s1239_s17 }
 0x37f   :  { %829 = vrot.lane.b32.xlu0 %v726_v57, %s1239_s17  ;;  %827 = vrot.lane.b32.xlu1 %v725_v50, %s1239_s17 }
 0x3c5   :  { %v1185_v2 = vpop.permute.xlu1 %1184  ;;  %v1190_v16 = vpop.permute.xlu0 %1189 }
 0x3c6   :  { %v1187_v21 = vunpack.i.h.bf16 %v1185_v2  ;;  %v1186_v47 = vunpack.i.l.bf16 %v1185_v2  ;;  %v1192_v30 = vunpack.i.h.bf16 %v1190_v16  ;;  %v1191_v44 = vunpack.i.l.bf16 %v1190_v16 }
 0x3c8   :  { %v749_v58 = vsel %vm272_vm5, %v1186_v47, %v1187_v21  ;;  %v750_v28 = vsel %vm272_vm5, %v1192_v30, %v1186_v47  ;;  %v748_v41 = vsel %vm272_vm5, %v1187_v21, %v1191_v44  ;;  %v747_v46 = vsel %vm272_vm5, %v1191_v44, %v1192_v30 }
 0x3c9   :  { %v1195_v43 = vpop.permute.xlu1 %1194  ;;  %v1200_v29 = vpop.permute.xlu0 %1199  ;;  %v768_v45 = vmul.f32 %v749_v58, %v1453_v3  ;;  %v767_v6 = vmul.f32 %v750_v28, %v1447_v19  ;;  %v769_v53 = vmul.f32 %v748_v41, %v1455_v4  ;;  %v770_v60 = vmul.f32 %v747_v46, %v1426_v8 }
 0x3ca   :  { %v1197_v15 = vunpack.i.h.bf16 %v1195_v43  ;;  %v1201_v56 = vunpack.i.l.bf16 %v1200_v29  ;;  %v1196_v61 = vunpack.i.l.bf16 %v1195_v43  ;;  %v1202_v47 = vunpack.i.h.bf16 %v1200_v29 }
 0x3cb   :  { %vm1806_vm5 = vcmp.lt.s32.totalorder %v1412_v20, 111 }
 0x3cc   :  { %v820_v30 = vsel %vm385_vm7, %v1197_v15, %v1201_v56  ;;  %v821_v43 = vsel %vm385_vm7, %v1196_v61, %v1197_v15  ;;  %v819_v41 = vsel %vm385_vm7, %v1201_v56, %v1202_v47 }
 0x3cd   :  { %v728_v24 = vpop.permute.xlu1 %727  ;;  %v730_v25 = vpop.permute.xlu0 %729 }
 0x3ce   :  { %v737_v32 = vsel %vm259_vm6, %v728_v24, %v730_v25 }
 0x3cf   :  { %v764_v23 = vmul.f32 %v737_v32, %v1453_v3  ;;  %v822_v32 = vsel %vm385_vm7, %v1202_v47, %v1196_v61  ;;  %v839_v61 = vmul.f32 %v821_v43, %v1460_v5  ;;  %vm1808_vm7 = vmmov %vm1806_vm5 }
 0x3d1   :  { %v734_v22 = vpop.permute.xlu0 %733  ;;  %v732_v48 = vpop.permute.xlu1 %731  ;;  %v848_v49 = vpack.c.bf16 %v768_v45, %v764_v23 }
 0x3d2   :  { %v738_v52 = vsel %vm259_vm6, %v734_v22, %v728_v24  ;;  %v735_v54 = vsel %vm259_vm6, %v732_v48, %v734_v22  ;;  %v736_v55 = vsel %vm259_vm6, %v730_v25, %v732_v48  ;;  %v840_v48 = vmul.f32 %v820_v30, %v1462_v10  ;;  %vm1807_vm6 = vmmov %vm1806_vm5 }
 0x3d3   :  { %v763_v26 = vmul.f32 %v738_v52, %v1447_v19  ;;  %v765_v27 = vmul.f32 %v736_v55, %v1455_v4  ;;  %v766_v59 = vmul.f32 %v735_v54, %v1426_v8  ;;  %879 = vmatprep.subr.bf16.mxu0 %v848_v49  ;;  %v841_v30 = vmul.f32 %v819_v41, %v1476_v17 }
 0x3d5   :  { %v847_v38 = vpack.c.bf16 %v767_v6, %v763_v26  ;;  %v849_v37 = vpack.c.bf16 %v769_v53, %v765_v27  ;;  %v754_v11 = vpop.permute.xlu0 %753  ;;  %v752_v35 = vpop.permute.xlu1 %751  ;;  %v850_v13 = vpack.c.bf16 %v770_v60, %v766_v59 }
 0x3d6   :  { %v761_v44 = vsel %vm285_vm8, %v752_v35, %v754_v11 }
 0x3d7   :  { %880 = vmatpush1.bf16.msra.mxu0 %v847_v38  ;;  %922 = vmatprep.subr.bf16.mxu1 %v850_v13  ;;  %v772_v46 = vmul.f32 %v761_v44, %v1453_v3 }
 0x3d8   :  { %923 = vmatpush1.bf16.msra.mxu1 %v849_v37 }
 0x3d9   :  { %v758_v39 = vpop.permute.xlu0 %757  ;;  %v756_v36 = vpop.permute.xlu1 %755 }
 0x3da   :  { %v759_v40 = vsel %vm285_vm8, %v756_v36, %v758_v39  ;;  %v760_v58 = vsel %vm285_vm8, %v754_v11, %v756_v36 }
 0x3db   :  { %v774_v50 = vmul.f32 %v759_v40, %v1426_v8  ;;  %v762_v8 = vsel %vm285_vm8, %v758_v39, %v752_v35  ;;  %v773_v6 = vmul.f32 %v760_v58, %v1455_v4  ;;  %vm1809_vm8 = vmmov %vm1806_vm5 }
 0x3dc   :  { %v771_v22 = vmul.f32 %v762_v8, %v1447_v19 }
 0x3dd   :  { %v1210_v31 = vpop.permute.xlu0 %1209  ;;  %v800_v51 = vpop.permute.xlu1 %799 }
 0x3de   :  { %v1212_v9 = vunpack.i.h.bf16 %v1210_v31  ;;  %v1211_v57 = vunpack.i.l.bf16 %v1210_v31  ;;  %v842_v31 = vmul.f32 %v822_v32, %v1478_v18 }
 0x3e0   :  { %v783_v62 = vsel %vm346_vm9, %v1211_v57, %v1212_v9 }
 0x3e1   :  { %v1220_v2 = vpop.permute.xlu0 %1219  ;;  %v804_v16 = vpop.permute.xlu1 %803  ;;  %v854_v21 = vpack.c.bf16 %v783_v62, %v774_v50 }
 0x3e2   :  { %v1222_v24 = vunpack.i.h.bf16 %v1220_v2  ;;  %v1221_v25 = vunpack.i.l.bf16 %v1220_v2 }
 0x3e3   :  { %924 = vmatprep.subr.bf16.mxu1 %v854_v21 }
 0x3e4   :  { %v795_v3 = vsel %vm359_vm10, %v1221_v25, %v1222_v24 }
 0x3e5   :  { %v802_v28 = vpop.permute.xlu0 %801  ;;  %v1205_v29 = vpop.permute.xlu1 %1204  ;;  %v857_v62 = vpack.c.bf16 %v795_v3, %v1619_v12 }
 0x3e6   :  { %v1207_v23 = vunpack.i.h.bf16 %v1205_v29  ;;  %v1206_v45 = vunpack.i.l.bf16 %v1205_v29  ;;  %v808_v49 = vsel %vm372_vm11, %v802_v28, %v804_v16  ;;  %v809_v59 = vsel %vm372_vm11, %v800_v51, %v802_v28 }
 0x3e7   :  { %v836_v11 = vmul.f32 %v808_v49, %v1462_v10 }
 0x3e8   :  { %v784_v52 = vsel %vm346_vm9, %v1207_v23, %v1211_v57  ;;  %v786_v53 = vsel %vm346_vm9, %v1212_v9, %v1206_v45  ;;  %v785_v54 = vsel %vm346_vm9, %v1206_v45, %v1207_v23  ;;  %vm1810_vm9 = vcmask 1043456  }
 0x3e9   :  { %v853_v19 = vpack.c.bf16 %v784_v52, %v773_v6  ;;  %v851_v55 = vpack.c.bf16 %v786_v53, %v771_v22  ;;  %v806_v4 = vpop.permute.xlu0 %805  ;;  %v1215_v26 = vpop.permute.xlu1 %1214  ;;  %v852_v27 = vpack.c.bf16 %v785_v54, %v772_v46  ;;  %vm1813_vm1 = vmmov %vm1810_vm9 }
 0x3ea   :  { %v810_v60 = vsel %vm372_vm11, %v806_v4, %v800_v51  ;;  %v1217_v38 = vunpack.i.h.bf16 %v1215_v26  ;;  %v1216_v37 = vunpack.i.l.bf16 %v1215_v26  ;;  %v807_v35 = vsel %vm372_vm11, %v804_v16, %v806_v4  ;;  %vm1812_vm11 = vmmov %vm1810_vm9 }
 0x3eb   :  { %v838_v13 = vmul.f32 %v810_v60, %v1478_v18  ;;  %881 = vmatprep.subr.bf16.mxu0 %v852_v27  ;;  %925 = vmatpush1.bf16.msra.mxu1 %v853_v19  ;;  %v835_v51 = vmul.f32 %v809_v59, %v1460_v5  ;;  %v837_v2 = vmul.f32 %v807_v35, %v1476_v17 }
 0x3ec   :  { %v797_v39 = vsel %vm359_vm10, %v1216_v37, %v1217_v38  ;;  %882 = vmatpush1.bf16.msra.mxu0 %v851_v55  ;;  %v796_v36 = vsel %vm359_vm10, %v1217_v38, %v1221_v25  ;;  %v798_v40 = vsel %vm359_vm10, %v1222_v24, %v1216_v37  ;;  %vm1811_vm10 = vmmov %vm1810_vm9 }
 0x3ed   :  { %v855_v9 = vpack.c.bf16 %v797_v39, %v1617_v0  ;;  %v826_v57 = vpop.permute.xlu0 %825  ;;  %v824_v50 = vpop.permute.xlu1 %823  ;;  %v856_v15 = vpack.c.bf16 %v796_v36, %v1621_v42  ;;  %v858_v56 = vpack.c.bf16 %v798_v40, %v1623_v63  ;;  %v860_v0 = vpack.c.bf16 %v840_v48, %v836_v11 }
 0x3ee   :  { %v833_v16 = vsel %vm1806_vm5, %v824_v50, %v826_v57  ;;  %v862_v47 = vpack.c.bf16 %v842_v31, %v838_v13  ;;  %v859_v42 = vpack.c.bf16 %v839_v61, %v835_v51  ;;  %v861_v44 = vpack.c.bf16 %v841_v30, %v837_v2 }
 0x3ef   :  { %v843_v21 = vmul.f32 %v833_v16, %v1460_v5  ;;  %883 = vmatprep.subr.bf16.mxu0 %v856_v15  ;;  %926 = vmatprep.subr.bf16.mxu1 %v858_v56 }
 0x3f0   :  { %884 = vmatpush1.bf16.msra.mxu0 %v855_v9  ;;  %927 = vmatpush1.bf16.msra.mxu1 %v857_v62 }
 0x3f1   :  { %v830_v63 = vpop.permute.xlu0 %829  ;;  %v828_v12 = vpop.permute.xlu1 %827  ;;  %885 = vmatprep.subr.bf16.mxu0 %v860_v0  ;;  %928 = vmatprep.subr.bf16.mxu1 %v862_v47  ;;  %v863_v43 = vpack.c.bf16 %v843_v21, %v843_v21 }
 0x3f2   :  { %v834_v8 = vsel %vm1807_vm6, %v830_v63, %v824_v50  ;;  %v831_v5 = vsel %vm1808_vm7, %v828_v12, %v830_v63  ;;  %v832_v58 = vsel %vm1809_vm8, %v826_v57, %v828_v12  ;;  %v1230_v50 = vld [vmem:[%s1798_s2] sm:$0xf] }
 0x3f3   :  { %v846_v24 = vmul.f32 %v834_v8, %v1478_v18  ;;  %v844_v25 = vmul.f32 %v832_v58, %v1462_v10  ;;  %v845_v28 = vmul.f32 %v831_v5, %v1476_v17  ;;  %v868_v23 = vsel %vm1812_vm11, %v863_v43, 0 }
 0x3f4   :  { %886 = vmatpush1.bf16.msra.mxu0 %v859_v42  ;;  %929 = vmatpush1.bf16.msra.mxu1 %v861_v44 }
 0x3f5   :  { %v866_v29 = vpack.c.bf16 %v846_v24, %v846_v24  ;;  %v864_v32 = vpack.c.bf16 %v844_v25, %v844_v25  ;;  %v865_v41 = vpack.c.bf16 %v845_v28, %v845_v28 }
 0x3f7   :  { %1122 = vmatprep.subr.msk.bf16.mxu0 %vm1810_vm9, %v864_v32  ;;  %1124 = vmatprep.subr.msk.bf16.mxu1 %vm1811_vm10, %v866_v29  ;;  %v874_v20 = vsel %vm1813_vm1, %v865_v41, 0 }
 0x3f8   :  { %888 = vmatpush1.bf16.msra.mxu0 %v868_v23  ;;  %931 = vmatpush1.bf16.msra.mxu1 %v874_v20 }
 0x3fb   :  { %1123 = vmatmul.mubr.msk.bf16.vlgmr.msra.gmra.mrb[12].mxu0 %vm1814_vm2, %v1585_v33  ;;  %1125 = vmatmul.mubr.msk.bf16.vlgmr.msra.gmra.mrb[12].mxu1 %vm1815_vm3, %v1585_v33 }
 0x3fc   :  { %1025 = vmatprep.mubr.bf16.mxu0 %v1231_v1  ;;  %1066 = vmatprep.mubr.bf16.mxu1 %v1231_v1 }
 0x4ce   :  { %v913_v10 = vpop.f32.mrb[12].mxu0  ;;  %v956_v17 = vpop.f32.mrb[12].mxu1 }
 0x4cf   :  { %v914_v18 = vadd.f32 %v913_v10, %v1593_v34  ;;  %v957_v45 = vadd.f32 %v956_v17, %v1593_v34  ;;  %v915_v46 = vpop.f32.mrb[13].mxu0  ;;  %v958_v22 = vpop.f32.mrb[13].mxu1 }
 0x4d0   :  { %v916_v6 = vadd.f32 %v915_v46, %v1593_v34  ;;  %v959_v48 = vadd.f32 %v958_v22, %v1593_v34  ;;  %v917_v49 = vpop.f32.mrb[14].mxu0  ;;  %v960_v52 = vpop.f32.mrb[14].mxu1 }
 0x4d1   :  { %vm965_vm4 = vcmp.gt.f32.partialorder %v914_v18, 0.0  ;;  %v973_v33 = vmul.f32 0.1, %v914_v18  ;;  %vm967_vm12 = vcmp.gt.f32.partialorder %v957_v45, 0.0  ;;  %v975_v53 = vmul.f32 0.1, %v957_v45 }
 0x4d2   :  { %vm966_vm13 = vcmp.gt.f32.partialorder %v916_v6, 0.0  ;;  %v974_v1 = vmul.f32 0.1, %v916_v6  ;;  %vm968_vm14 = vcmp.gt.f32.partialorder %v959_v48, 0.0  ;;  %v976_v54 = vmul.f32 0.1, %v959_v48 }
 0x4d3   :  { %v918_v3 = vadd.f32 %v917_v49, %v1599_v14  ;;  %v961_v19 = vadd.f32 %v960_v52, %v1599_v14  ;;  %v919_v55 = vpop.f32.mrb[15].mxu0  ;;  %v962_v4 = vpop.f32.mrb[15].mxu1  ;;  %v981_v26 = vsel %vm965_vm4, %v914_v18, %v973_v33  ;;  %v983_v27 = vsel %vm967_vm12, %v957_v45, %v975_v53 }
 0x4d4   :  { %v920_v34 = vadd.f32 %v919_v55, %v1599_v14  ;;  %v963_v59 = vadd.f32 %v962_v4, %v1599_v14  ;;  %v982_v39 = vsel %vm966_vm13, %v916_v6, %v974_v1  ;;  %v984_v36 = vsel %vm968_vm14, %v959_v48, %v976_v54 }
 0x4d5   :  { %vm969_vm15 = vcmp.gt.f32.partialorder %v918_v3, 0.0  ;;  %v977_v60 = vmul.f32 0.1, %v918_v3  ;;  %vm971_vm5 = vcmp.gt.f32.partialorder %v961_v19, 0.0  ;;  %v979_v38 = vmul.f32 0.1, %v961_v19 }
 0x4d6   :  { %vm970_vm6 = vcmp.gt.f32.partialorder %v920_v34, 0.0  ;;  %v978_v37 = vmul.f32 0.1, %v920_v34  ;;  %vm972_vm7 = vcmp.gt.f32.partialorder %v963_v59, 0.0  ;;  %v980_v11 = vmul.f32 0.1, %v963_v59 }
 0x4d7   :  { %v985_v35 = vsel %vm969_vm15, %v918_v3, %v977_v60  ;;  %v987_v13 = vsel %vm971_vm5, %v961_v19, %v979_v38 }
 0x4d8   :  { %v989_v40 = vpack.c.bf16 %v985_v35, %v981_v26  ;;  %v991_v31 = vpack.c.bf16 %v987_v13, %v983_v27  ;;  %v986_v51 = vsel %vm970_vm6, %v920_v34, %v978_v37  ;;  %v988_v9 = vsel %vm972_vm7, %v963_v59, %v980_v11 }
 0x4d9   :  { %v990_v57 = vpack.c.bf16 %v986_v51, %v982_v39  ;;  %v992_v14 = vpack.c.bf16 %v988_v9, %v984_v36 }
 0x4db   :  { %993 = vmatprep.subr.bf16.mxu0 %v990_v57  ;;  %1034 = vmatprep.subr.bf16.mxu1 %v992_v14 }
 0x4dc   :  { %994 = vmatpush1.bf16.msra.mxu0 %v989_v40  ;;  %1035 = vmatpush1.bf16.msra.mxu1 %v991_v31 }
 0x4df   :  { %1126 = vmatmul.mubr.msk.bf16.vlgmr.msra.gmra.mrb[16].mxu0 %vm61_vm0, %v1230_v50  ;;  %1127 = vmatmul.mubr.msk.bf16.vlgmr.msra.gmra.mrb[16].mxu1 %vm61_vm0, %v1230_v50 }
 0x5b2   :  { %v1027_v15 = vpop.f32.mrb[16].mxu0  ;;  %v1068_v56 = vpop.f32.mrb[16].mxu1 }
 0x5b3   :  { %v1028_v62 = vadd.f32 %v1027_v15, %v1305_v7  ;;  %v1069_v61 = vadd.f32 %v1068_v56, %v1305_v7  ;;  %v1029_v2 = vpop.f32.mrb[17].mxu0  ;;  %v1070_v16 = vpop.f32.mrb[17].mxu1 }
 0x5b4   :  { %v1030_v21 = vadd.f32 %v1029_v2, %v1305_v7  ;;  %v1071_v0 = vadd.f32 %v1070_v16, %v1305_v7  ;;  %v1031_v47 = vpop.f32.mrb[18].mxu0  ;;  %v1072_v30 = vpop.f32.mrb[18].mxu1 }
 0x5b5   :  { %vm1075_vm8 = vcmp.gt.f32.partialorder %v1028_v62, 0.0  ;;  %v1079_v42 = vmul.f32 0.1, %v1028_v62  ;;  %vm1077_vm9 = vcmp.gt.f32.partialorder %v1069_v61, 0.0  ;;  %v1081_v63 = vmul.f32 0.1, %v1069_v61 }
 0x5b6   :  { %vm1076_vm10 = vcmp.gt.f32.partialorder %v1030_v21, 0.0  ;;  %v1080_v12 = vmul.f32 0.1, %v1030_v21  ;;  %vm1078_vm0 = vcmp.gt.f32.partialorder %v1071_v0, 0.0  ;;  %v1082_v44 = vmul.f32 0.1, %v1071_v0 }
 0x5b7   :  { %v1083_v8 = vsel %vm1075_vm8, %v1028_v62, %v1079_v42  ;;  %v1085_v5 = vsel %vm1077_vm9, %v1069_v61, %v1081_v63  ;;  %v1032_v58 = vpop.f32.mrb[19].mxu0  ;;  %v1073_v43 = vpop.f32.mrb[19].mxu1 }
 0x5b8   :  { %v1084_v24 = vsel %vm1076_vm10, %v1030_v21, %v1080_v12  ;;  %v1086_v25 = vsel %vm1078_vm0, %v1071_v0, %v1082_v44 }
 0x5b9   :  { %v1130_v28 = vpack.c.bf16 %v1084_v24, %v1083_v8  ;;  %v1131_v29 = vpack.c.bf16 %v1086_v25, %v1085_v5 }
 0x5bb   :  { %1103 = vst [vmem:[%s1802_s6] sm:$0xff] %v1130_v28  ;;  %1104 = vst [vmem:[%s1802_s6 + $0x8] sm:$0xff] %v1131_v29 }

</bundles_post_ra>
